<compile_context>
chip_gen: v7x
topology: tpu7x:2x2x1
jax: 0.10.0
libtpu: 0.0.40
codegen_flags: <defaults>
</compile_context>

<pallas_src>
import jax
import jax.numpy as jnp
from jax.experimental import pallas as pl
from jax.experimental.pallas import tpu as pltpu


def _round_up(x, m):
    return (x + m - 1) // m * m


# ---------------------------------------------------------------------------
# Kernel: whole 4-layer residual MLP fused; weights VMEM-resident.
# ---------------------------------------------------------------------------
def actor_res_kernel(x_ref,
                     w0_ref, b0_ref,
                     w1_ref, b1_ref,
                     w2_ref, b2_ref,
                     w3_ref, b3_ref,
                     o_ref):
    # MXU operand dtype (f32 or bf16); accumulation and all VPU/EUP math
    # (bias, relu, residual add, tanh) stay f32.
    cdt = w0_ref.dtype
    x = x_ref[...].astype(cdt)

    # layer 0 + relu (residual source); contraction over the real input width.
    h0 = jnp.dot(x, w0_ref[...], preferred_element_type=jnp.float32)
    h0 = jnp.maximum(h0 + b0_ref[...], 0.0)

    # layer 1 + relu
    h1 = jnp.dot(h0.astype(cdt), w1_ref[...], preferred_element_type=jnp.float32)
    h1 = jnp.maximum(h1 + b1_ref[...], 0.0)

    # layer 2 + residual add + relu (f32 residual add)
    h2 = jnp.dot(h1.astype(cdt), w2_ref[...], preferred_element_type=jnp.float32)
    h2 = jnp.maximum(h2 + b2_ref[...] + h0, 0.0)

    # layer 3 + tanh, stored lane-exact (out_size lanes)
    y = jnp.dot(h2.astype(cdt), w3_ref[...], preferred_element_type=jnp.float32)
    o_ref[...] = jnp.tanh(y + b3_ref[...]).astype(o_ref.dtype)


# ---------------------------------------------------------------------------
# Parameter preparation: only the *hidden* dims are zero-padded to a multiple
# of 128 (exact: relu(0)=0, zero rows/cols contribute nothing).  Input and
# output feature dims stay at their real widths so x / out HBM traffic is not
# inflated.  Weights may be cast to bf16 (biases stay f32).
# ---------------------------------------------------------------------------
def prepare_params(params, weight_dtype=jnp.float32):
    in_size, hid = params["w0"].shape
    out_size = params["w3"].shape[1]
    hid_p = _round_up(hid, 128)

    def pad_cols(a, c):
        return jnp.pad(a, ((0, 0), (0, c - a.shape[1])))

    def pad_rc(a, r, c):
        return jnp.pad(a, ((0, r - a.shape[0]), (0, c - a.shape[1])))

    padded = dict(
        w0=pad_cols(params["w0"], hid_p).astype(weight_dtype),        # (in, hid_p)
        b0=pad_cols(params["b0"], hid_p).astype(jnp.float32),         # (1, hid_p)
        w1=pad_rc(params["w1"], hid_p, hid_p).astype(weight_dtype),   # (hid_p, hid_p)
        b1=pad_cols(params["b1"], hid_p).astype(jnp.float32),
        w2=pad_rc(params["w2"], hid_p, hid_p).astype(weight_dtype),
        b2=pad_cols(params["b2"], hid_p).astype(jnp.float32),
        w3=jnp.pad(params["w3"], ((0, hid_p - hid), (0, 0))).astype(weight_dtype),  # (hid_p, out)
        b3=params["b3"].astype(jnp.float32),                          # (1, out)
    )
    meta = dict(in_size=in_size, hid_size=hid, hid_pad=hid_p, out_size=out_size)
    return padded, meta


# ---------------------------------------------------------------------------
# Wrapper
# ---------------------------------------------------------------------------
def actor_res_forward(x, padded_params, meta, *, batch_tile=512,
                      single_buffer_weights=True):
    """x: (B, input_size) f32 or bf16. padded_params/meta from prepare_params."""
    B, in_size = x.shape
    assert in_size == meta["in_size"]
    hid, hid_p = meta["hid_size"], meta["hid_pad"]
    out_size = meta["out_size"]

    # Sublane granularity of the batch axis (f32 -> 8, bf16 -> 16, int8 -> 32).
    itemsize = jnp.dtype(x.dtype).itemsize
    sub = {4: 8, 2: 16, 1: 32}.get(itemsize, 8)

    # Batch tiling: pad B only to a sublane multiple; choose the step count so
    # the tile near-divides the padded batch (no big wasted last tile) and,
    # when the batch allows it, use >= 2 grid steps so both v7x TensorCores
    # participate on the "parallel" batch axis.
    B8 = _round_up(B, sub)
    n_steps = max(1, pl.cdiv(B8, batch_tile))
    if n_steps == 1 and B8 >= 2 * sub:
        n_steps = 2
    tb = _round_up(pl.cdiv(B8, n_steps), sub)
    B_pad = n_steps * tb

    # Only (cheap) batch-row zero padding; no feature padding in HBM.
    xp = x if B_pad == B else jnp.pad(x, ((0, B_pad - B), (0, 0)))

    p = padded_params
    operands = (xp,
                p["w0"], p["b0"], p["w1"], p["b1"],
                p["w2"], p["b2"], p["w3"], p["b3"])
    weight_bytes = sum(int(op.size) * jnp.dtype(op.dtype).itemsize
                       for op in operands[1:])

    # x / out tiled along batch only (full-last-dim blocks are legal even when
    # the feature width < 128); weights & biases are full-array blocks with a
    # constant block index -> VMEM-resident, never re-DMA'd across the grid.
    x_spec = pl.BlockSpec((tb, in_size), lambda i: (i, 0))
    out_spec = pl.BlockSpec((tb, out_size), lambda i: (i, 0))

    # VMEM budget from actual buffer sizes, capped at ~85% of core capacity.
    x_tile = tb * in_size * itemsize
    out_tile = tb * out_size * 4
    act_bytes = 4 * tb * hid_p * 4            # h0..h2 + one temporary (f32)
    need = (weight_bytes * (1 if single_buffer_weights else 2)
            + 2 * (x_tile + out_tile) + act_bytes)
    try:
        cap = int(0.85 * pltpu.get_tpu_info().vmem_capacity_bytes)
    except Exception:
        cap = 54 << 20                        # conservative: v7x has 64 MiB/core
    vmem_bytes = min(max(int(1.3 * need) + (2 << 20), 32 << 20), cap)

    # Advisory cost: useful flops and true (feature-unpadded) byte traffic.
    flops = 2 * B_pad * (in_size * hid + 2 * hid * hid + hid * out_size)
    bytes_accessed = (B_pad * in_size * itemsize
                      + weight_bytes
                      + B_pad * out_size * 4)
    cost = pl.CostEstimate(flops=flops, transcendentals=B_pad * out_size,
                           bytes_accessed=bytes_accessed)

    def run(single_buffer):
        def const_spec(shape):
            if single_buffer:
                # Constant block index across the grid -> one buffer suffices.
                return pl.BlockSpec(shape, lambda i: (0, 0),
                                    pipeline_mode=pl.Buffered(1))
            return pl.BlockSpec(shape, lambda i: (0, 0))

        in_specs = [x_spec] + [const_spec(op.shape) for op in operands[1:]]
        return pl.pallas_call(
            actor_res_kernel,
            out_shape=jax.ShapeDtypeStruct((B_pad, out_size), jnp.float32),
            grid=(n_steps,),
            in_specs=in_specs,
            out_specs=out_spec,
            compiler_params=pltpu.CompilerParams(
                dimension_semantics=("parallel",),
                vmem_limit_bytes=vmem_bytes),
            cost_estimate=cost,
        )(*operands)

    if single_buffer_weights:
        try:
            out = run(True)
        except Exception:
            # pipeline_mode=Buffered(1) not accepted by this build: fall back
            # to default double-buffered constant blocks (correctness same).
            out = run(False)
    else:
        out = run(False)

    return out if B_pad == B else out[:B]


# ---------------------------------------------------------------------------
# Init + pure-JAX reference (PyTorch bn=False forward)
# ---------------------------------------------------------------------------
def init_params(key, input_size, hidden_size, output_size):
    """Mimics nn.Linear's uniform(-1/sqrt(fan_in), 1/sqrt(fan_in)) init."""
    def linear(k, fan_in, fan_out):
        kw, kb = jax.random.split(k)
        bound = 1.0 / jnp.sqrt(jnp.float32(fan_in))
        w = jax.random.uniform(kw, (fan_in, fan_out), jnp.float32, -bound, bound)
        b = jax.random.uniform(kb, (1, fan_out), jnp.float32, -bound, bound)
        return w, b

    k0, k1, k2, k3 = jax.random.split(key, 4)
    w0, b0 = linear(k0, input_size, hidden_size)
    w1, b1 = linear(k1, hidden_size, hidden_size)
    w2, b2 = linear(k2, hidden_size, hidden_size)
    w3, b3 = linear(k3, hidden_size, output_size)
    return dict(w0=w0, b0=b0, w1=w1, b1=b1, w2=w2, b2=b2, w3=w3, b3=b3)


def reference_forward(x, p):
    h0 = jnp.maximum(x @ p["w0"] + p["b0"], 0.0)
    h1 = jnp.maximum(h0 @ p["w1"] + p["b1"], 0.0)
    h2 = jnp.maximum(h1 @ p["w2"] + p["b2"] + h0, 0.0)
    return jnp.tanh(h2 @ p["w3"] + p["b3"])


if __name__ == "__main__":
    # TODO(synk): BatchNorm1d branch (bn=True) not implemented; bn=False path only.
    key = jax.random.PRNGKey(0)
    k_params, k_x = jax.random.split(key)

    batch, input_size, hidden_size, output_size = 2, 16, 32, 8
    params = init_params(k_params, input_size, hidden_size, output_size)
    x = jax.random.normal(k_x, (batch, input_size), jnp.float32)

    ref = reference_forward(x, params)

    # f32 path: exact module semantics.
    pp32, meta32 = prepare_params(params, weight_dtype=jnp.float32)
    out32 = jax.block_until_ready(actor_res_forward(x, pp32, meta32))
    assert out32.shape == (batch, output_size)
    assert jnp.allclose(out32, ref, atol=3e-5, rtol=3e-5), "f32 kernel mismatch"

    # bf16 weights + bf16 x (MXU-native rate, f32 accumulation / elementwise).
    ppbf, metabf = prepare_params(params, weight_dtype=jnp.bfloat16)
    outbf = jax.block_until_ready(
        actor_res_forward(x.astype(jnp.bfloat16), ppbf, metabf))
    assert outbf.shape == (batch, output_size)
    assert bool(jnp.all(jnp.isfinite(outbf)))
    assert jnp.allclose(outbf, ref, atol=0.08), "bf16 kernel far from reference"

    print("KERNEL_OK")
</pallas_src>

<mosaic_0001>
module attributes {stable_mosaic.version = 11 : i64} {
  func.func @actor_res_kernel(%arg0: i32, %arg1: memref<8x16xf32, #tpu.memory_space<vmem>>, %arg2: memref<16x128xf32, #tpu.memory_space<vmem>>, %arg3: memref<1x128xf32, #tpu.memory_space<vmem>>, %arg4: memref<128x128xf32, #tpu.memory_space<vmem>>, %arg5: memref<1x128xf32, #tpu.memory_space<vmem>>, %arg6: memref<128x128xf32, #tpu.memory_space<vmem>>, %arg7: memref<1x128xf32, #tpu.memory_space<vmem>>, %arg8: memref<128x8xf32, #tpu.memory_space<vmem>>, %arg9: memref<1x8xf32, #tpu.memory_space<vmem>>, %arg10: memref<8x8xf32, #tpu.memory_space<vmem>>) attributes {dimension_semantics = [#tpu.dimension_semantics<parallel>], iteration_bounds = array<i64: 1>, scalar_prefetch = 0 : i64, scratch_operands = 0 : i64, tpu.core_type = #tpu.core_type<tc>, window_params = [{transform_indices = @transform_0, window_bounds = array<i64: 8, 16>}, {pipeline_mode = #tpu.pipeline_mode<synchronous>, transform_indices = @transform_1, window_bounds = array<i64: 16, 128>}, {pipeline_mode = #tpu.pipeline_mode<synchronous>, transform_indices = @transform_2, window_bounds = array<i64: 1, 128>}, {pipeline_mode = #tpu.pipeline_mode<synchronous>, transform_indices = @transform_3, window_bounds = array<i64: 128, 128>}, {pipeline_mode = #tpu.pipeline_mode<synchronous>, transform_indices = @transform_4, window_bounds = array<i64: 1, 128>}, {pipeline_mode = #tpu.pipeline_mode<synchronous>, transform_indices = @transform_5, window_bounds = array<i64: 128, 128>}, {pipeline_mode = #tpu.pipeline_mode<synchronous>, transform_indices = @transform_6, window_bounds = array<i64: 1, 128>}, {pipeline_mode = #tpu.pipeline_mode<synchronous>, transform_indices = @transform_7, window_bounds = array<i64: 128, 8>}, {pipeline_mode = #tpu.pipeline_mode<synchronous>, transform_indices = @transform_8, window_bounds = array<i64: 1, 8>}, {transform_indices = @transform_9, window_bounds = array<i64: 8, 8>}]} {
    %c0 = arith.constant 0 : index
    %c0_0 = arith.constant 0 : index
    %0 = vector.load %arg1[%c0, %c0_0] : memref<8x16xf32, #tpu.memory_space<vmem>>, vector<8x16xf32>
    %c0_1 = arith.constant 0 : index
    %c0_2 = arith.constant 0 : index
    %1 = vector.load %arg2[%c0_1, %c0_2] : memref<16x128xf32, #tpu.memory_space<vmem>>, vector<16x128xf32>
    %cst = arith.constant dense<0.000000e+00> : vector<8x128xf32>
    %2 = tpu.matmul %0, %1, %cst {dimension_numbers = #tpu.dot_dimension_numbers<[1], [0], [0], [1], [0, 0, 1, 1], [], []>} : vector<8x16xf32>, vector<16x128xf32>, vector<8x128xf32> -> vector<8x128xf32>
    %c0_3 = arith.constant 0 : index
    %c0_4 = arith.constant 0 : index
    %3 = vector.load %arg3[%c0_3, %c0_4] : memref<1x128xf32, #tpu.memory_space<vmem>>, vector<1x128xf32>
    %4 = vector.broadcast %3 : vector<1x128xf32> to vector<8x128xf32>
    %5 = arith.addf %2, %4 : vector<8x128xf32>
    %cst_5 = arith.constant 0.000000e+00 : f32
    %6 = vector.broadcast %cst_5 : f32 to vector<8x128xf32>
    %7 = arith.maximumf %5, %6 : vector<8x128xf32>
    %c0_6 = arith.constant 0 : index
    %c0_7 = arith.constant 0 : index
    %8 = vector.load %arg4[%c0_6, %c0_7] : memref<128x128xf32, #tpu.memory_space<vmem>>, vector<128x128xf32>
    %cst_8 = arith.constant dense<0.000000e+00> : vector<8x128xf32>
    %9 = tpu.matmul %7, %8, %cst_8 {dimension_numbers = #tpu.dot_dimension_numbers<[1], [0], [0], [1], [0, 0, 1, 1], [], []>} : vector<8x128xf32>, vector<128x128xf32>, vector<8x128xf32> -> vector<8x128xf32>
    %c0_9 = arith.constant 0 : index
    %c0_10 = arith.constant 0 : index
    %10 = vector.load %arg5[%c0_9, %c0_10] : memref<1x128xf32, #tpu.memory_space<vmem>>, vector<1x128xf32>
    %11 = vector.broadcast %10 : vector<1x128xf32> to vector<8x128xf32>
    %12 = arith.addf %9, %11 : vector<8x128xf32>
    %cst_11 = arith.constant 0.000000e+00 : f32
    %13 = vector.broadcast %cst_11 : f32 to vector<8x128xf32>
    %14 = arith.maximumf %12, %13 : vector<8x128xf32>
    %c0_12 = arith.constant 0 : index
    %c0_13 = arith.constant 0 : index
    %15 = vector.load %arg6[%c0_12, %c0_13] : memref<128x128xf32, #tpu.memory_space<vmem>>, vector<128x128xf32>
    %cst_14 = arith.constant dense<0.000000e+00> : vector<8x128xf32>
    %16 = tpu.matmul %14, %15, %cst_14 {dimension_numbers = #tpu.dot_dimension_numbers<[1], [0], [0], [1], [0, 0, 1, 1], [], []>} : vector<8x128xf32>, vector<128x128xf32>, vector<8x128xf32> -> vector<8x128xf32>
    %c0_15 = arith.constant 0 : index
    %c0_16 = arith.constant 0 : index
    %17 = vector.load %arg7[%c0_15, %c0_16] : memref<1x128xf32, #tpu.memory_space<vmem>>, vector<1x128xf32>
    %18 = vector.broadcast %17 : vector<1x128xf32> to vector<8x128xf32>
    %19 = arith.addf %16, %18 : vector<8x128xf32>
    %20 = arith.addf %19, %7 : vector<8x128xf32>
    %cst_17 = arith.constant 0.000000e+00 : f32
    %21 = vector.broadcast %cst_17 : f32 to vector<8x128xf32>
    %22 = arith.maximumf %20, %21 : vector<8x128xf32>
    %c0_18 = arith.constant 0 : index
    %c0_19 = arith.constant 0 : index
    %23 = vector.load %arg8[%c0_18, %c0_19] : memref<128x8xf32, #tpu.memory_space<vmem>>, vector<128x8xf32>
    %cst_20 = arith.constant dense<0.000000e+00> : vector<8x8xf32>
    %24 = tpu.matmul %22, %23, %cst_20 {dimension_numbers = #tpu.dot_dimension_numbers<[1], [0], [0], [1], [0, 0, 1, 1], [], []>} : vector<8x128xf32>, vector<128x8xf32>, vector<8x8xf32> -> vector<8x8xf32>
    %c0_21 = arith.constant 0 : index
    %c0_22 = arith.constant 0 : index
    %25 = vector.load %arg9[%c0_21, %c0_22] : memref<1x8xf32, #tpu.memory_space<vmem>>, vector<1x8xf32>
    %26 = vector.broadcast %25 : vector<1x8xf32> to vector<8x8xf32>
    %27 = arith.addf %24, %26 : vector<8x8xf32>
    %28 = math.tanh %27 : vector<8x8xf32>
    %c0_23 = arith.constant 0 : index
    %c0_24 = arith.constant 0 : index
    %29 = vector.load %arg10[%c0_23, %c0_24] : memref<8x8xf32, #tpu.memory_space<vmem>>, vector<8x8xf32>
    tpu.vector_store %arg10[%c0_23, %c0_24], %28 {strides = array<i32>} : memref<8x8xf32, #tpu.memory_space<vmem>>, vector<8x8xf32>,
    return
  }
  func.func @transform_0(%arg0: i32) -> (i32, i32) {
    %c0_i32 = arith.constant 0 : i32
    %c0_i32_0 = arith.constant 0 : i32
    return %arg0, %c0_i32 : i32, i32
  }
  func.func @transform_1(%arg0: i32) -> (i32, i32) {
    %c0_i32 = arith.constant 0 : i32
    %c0_i32_0 = arith.constant 0 : i32
    %c0_i32_1 = arith.constant 0 : i32
    return %c0_i32, %c0_i32_0 : i32, i32
  }
  func.func @transform_2(%arg0: i32) -> (i32, i32) {
    %c0_i32 = arith.constant 0 : i32
    %c0_i32_0 = arith.constant 0 : i32
    %c0_i32_1 = arith.constant 0 : i32
    return %c0_i32, %c0_i32_0 : i32, i32
  }
  func.func @transform_3(%arg0: i32) -> (i32, i32) {
    %c0_i32 = arith.constant 0 : i32
    %c0_i32_0 = arith.constant 0 : i32
    %c0_i32_1 = arith.constant 0 : i32
    return %c0_i32, %c0_i32_0 : i32, i32
  }
  func.func @transform_4(%arg0: i32) -> (i32, i32) {
    %c0_i32 = arith.constant 0 : i32
    %c0_i32_0 = arith.constant 0 : i32
    %c0_i32_1 = arith.constant 0 : i32
    return %c0_i32, %c0_i32_0 : i32, i32
  }
  func.func @transform_5(%arg0: i32) -> (i32, i32) {
    %c0_i32 = arith.constant 0 : i32
    %c0_i32_0 = arith.constant 0 : i32
    %c0_i32_1 = arith.constant 0 : i32
    return %c0_i32, %c0_i32_0 : i32, i32
  }
  func.func @transform_6(%arg0: i32) -> (i32, i32) {
    %c0_i32 = arith.constant 0 : i32
    %c0_i32_0 = arith.constant 0 : i32
    %c0_i32_1 = arith.constant 0 : i32
    return %c0_i32, %c0_i32_0 : i32, i32
  }
  func.func @transform_7(%arg0: i32) -> (i32, i32) {
    %c0_i32 = arith.constant 0 : i32
    %c0_i32_0 = arith.constant 0 : i32
    %c0_i32_1 = arith.constant 0 : i32
    return %c0_i32, %c0_i32_0 : i32, i32
  }
  func.func @transform_8(%arg0: i32) -> (i32, i32) {
    %c0_i32 = arith.constant 0 : i32
    %c0_i32_0 = arith.constant 0 : i32
    %c0_i32_1 = arith.constant 0 : i32
    return %c0_i32, %c0_i32_0 : i32, i32
  }
  func.func @transform_9(%arg0: i32) -> (i32, i32) {
    %c0_i32 = arith.constant 0 : i32
    %c0_i32_0 = arith.constant 0 : i32
    return %arg0, %c0_i32 : i32, i32
  }
}

module attributes {stable_mosaic.version = 11 : i64} {
  func.func @actor_res_kernel(%arg0: i32, %arg1: memref<8x16xf32, #tpu.memory_space<vmem>>, %arg2: memref<16x128xf32, #tpu.memory_space<vmem>>, %arg3: memref<1x128xf32, #tpu.memory_space<vmem>>, %arg4: memref<128x128xf32, #tpu.memory_space<vmem>>, %arg5: memref<1x128xf32, #tpu.memory_space<vmem>>, %arg6: memref<128x128xf32, #tpu.memory_space<vmem>>, %arg7: memref<1x128xf32, #tpu.memory_space<vmem>>, %arg8: memref<128x8xf32, #tpu.memory_space<vmem>>, %arg9: memref<1x8xf32, #tpu.memory_space<vmem>>, %arg10: memref<8x8xf32, #tpu.memory_space<vmem>>) attributes {dimension_semantics = [#tpu.dimension_semantics<parallel>], iteration_bounds = array<i64: 1>, scalar_prefetch = 0 : i64, scratch_operands = 0 : i64, tpu.core_type = #tpu.core_type<tc>, window_params = [{transform_indices = @transform_0, window_bounds = array<i64: 8, 16>}, {pipeline_mode = #tpu.pipeline_mode<synchronous>, transform_indices = @transform_1, window_bounds = array<i64: 16, 128>}, {pipeline_mode = #tpu.pipeline_mode<synchronous>, transform_indices = @transform_2, window_bounds = array<i64: 1, 128>}, {pipeline_mode = #tpu.pipeline_mode<synchronous>, transform_indices = @transform_3, window_bounds = array<i64: 128, 128>}, {pipeline_mode = #tpu.pipeline_mode<synchronous>, transform_indices = @transform_4, window_bounds = array<i64: 1, 128>}, {pipeline_mode = #tpu.pipeline_mode<synchronous>, transform_indices = @transform_5, window_bounds = array<i64: 128, 128>}, {pipeline_mode = #tpu.pipeline_mode<synchronous>, transform_indices = @transform_6, window_bounds = array<i64: 1, 128>}, {pipeline_mode = #tpu.pipeline_mode<synchronous>, transform_indices = @transform_7, window_bounds = array<i64: 128, 8>}, {pipeline_mode = #tpu.pipeline_mode<synchronous>, transform_indices = @transform_8, window_bounds = array<i64: 1, 8>}, {transform_indices = @transform_9, window_bounds = array<i64: 8, 8>}]} {
    %c0 = arith.constant 0 : index
    %c0_0 = arith.constant 0 : index
    %0 = vector.load %arg1[%c0, %c0_0] : memref<8x16xf32, #tpu.memory_space<vmem>>, vector<8x16xf32>
    %c0_1 = arith.constant 0 : index
    %c0_2 = arith.constant 0 : index
    %1 = vector.load %arg2[%c0_1, %c0_2] : memref<16x128xf32, #tpu.memory_space<vmem>>, vector<16x128xf32>
    %cst = arith.constant dense<0.000000e+00> : vector<8x128xf32>
    %2 = tpu.matmul %0, %1, %cst {dimension_numbers = #tpu.dot_dimension_numbers<[1], [0], [0], [1], [0, 0, 1, 1], [], []>} : vector<8x16xf32>, vector<16x128xf32>, vector<8x128xf32> -> vector<8x128xf32>
    %c0_3 = arith.constant 0 : index
    %c0_4 = arith.constant 0 : index
    %3 = vector.load %arg3[%c0_3, %c0_4] : memref<1x128xf32, #tpu.memory_space<vmem>>, vector<1x128xf32>
    %4 = vector.broadcast %3 : vector<1x128xf32> to vector<8x128xf32>
    %5 = arith.addf %2, %4 : vector<8x128xf32>
    %cst_5 = arith.constant 0.000000e+00 : f32
    %6 = vector.broadcast %cst_5 : f32 to vector<8x128xf32>
    %7 = arith.maximumf %5, %6 : vector<8x128xf32>
    %c0_6 = arith.constant 0 : index
    %c0_7 = arith.constant 0 : index
    %8 = vector.load %arg4[%c0_6, %c0_7] : memref<128x128xf32, #tpu.memory_space<vmem>>, vector<128x128xf32>
    %cst_8 = arith.constant dense<0.000000e+00> : vector<8x128xf32>
    %9 = tpu.matmul %7, %8, %cst_8 {dimension_numbers = #tpu.dot_dimension_numbers<[1], [0], [0], [1], [0, 0, 1, 1], [], []>} : vector<8x128xf32>, vector<128x128xf32>, vector<8x128xf32> -> vector<8x128xf32>
    %c0_9 = arith.constant 0 : index
    %c0_10 = arith.constant 0 : index
    %10 = vector.load %arg5[%c0_9, %c0_10] : memref<1x128xf32, #tpu.memory_space<vmem>>, vector<1x128xf32>
    %11 = vector.broadcast %10 : vector<1x128xf32> to vector<8x128xf32>
    %12 = arith.addf %9, %11 : vector<8x128xf32>
    %cst_11 = arith.constant 0.000000e+00 : f32
    %13 = vector.broadcast %cst_11 : f32 to vector<8x128xf32>
    %14 = arith.maximumf %12, %13 : vector<8x128xf32>
    %c0_12 = arith.constant 0 : index
    %c0_13 = arith.constant 0 : index
    %15 = vector.load %arg6[%c0_12, %c0_13] : memref<128x128xf32, #tpu.memory_space<vmem>>, vector<128x128xf32>
    %cst_14 = arith.constant dense<0.000000e+00> : vector<8x128xf32>
    %16 = tpu.matmul %14, %15, %cst_14 {dimension_numbers = #tpu.dot_dimension_numbers<[1], [0], [0], [1], [0, 0, 1, 1], [], []>} : vector<8x128xf32>, vector<128x128xf32>, vector<8x128xf32> -> vector<8x128xf32>
    %c0_15 = arith.constant 0 : index
    %c0_16 = arith.constant 0 : index
    %17 = vector.load %arg7[%c0_15, %c0_16] : memref<1x128xf32, #tpu.memory_space<vmem>>, vector<1x128xf32>
    %18 = vector.broadcast %17 : vector<1x128xf32> to vector<8x128xf32>
    %19 = arith.addf %16, %18 : vector<8x128xf32>
    %20 = arith.addf %19, %7 : vector<8x128xf32>
    %cst_17 = arith.constant 0.000000e+00 : f32
    %21 = vector.broadcast %cst_17 : f32 to vector<8x128xf32>
    %22 = arith.maximumf %20, %21 : vector<8x128xf32>
    %c0_18 = arith.constant 0 : index
    %c0_19 = arith.constant 0 : index
    %23 = vector.load %arg8[%c0_18, %c0_19] : memref<128x8xf32, #tpu.memory_space<vmem>>, vector<128x8xf32>
    %cst_20 = arith.constant dense<0.000000e+00> : vector<8x8xf32>
    %24 = tpu.matmul %22, %23, %cst_20 {dimension_numbers = #tpu.dot_dimension_numbers<[1], [0], [0], [1], [0, 0, 1, 1], [], []>} : vector<8x128xf32>, vector<128x8xf32>, vector<8x8xf32> -> vector<8x8xf32>
    %c0_21 = arith.constant 0 : index
    %c0_22 = arith.constant 0 : index
    %25 = vector.load %arg9[%c0_21, %c0_22] : memref<1x8xf32, #tpu.memory_space<vmem>>, vector<1x8xf32>
    %26 = vector.broadcast %25 : vector<1x8xf32> to vector<8x8xf32>
    %27 = arith.addf %24, %26 : vector<8x8xf32>
    %28 = math.tanh %27 : vector<8x8xf32>
    %c0_23 = arith.constant 0 : index
    %c0_24 = arith.constant 0 : index
    %29 = vector.load %arg10[%c0_23, %c0_24] : memref<8x8xf32, #tpu.memory_space<vmem>>, vector<8x8xf32>
    tpu.vector_store %arg10[%c0_23, %c0_24], %28 {strides = array<i32>} : memref<8x8xf32, #tpu.memory_space<vmem>>, vector<8x8xf32>,
    return
  }
  func.func @transform_0(%arg0: i32) -> (i32, i32) {
    %c0_i32 = arith.constant 0 : i32
    %c0_i32_0 = arith.constant 0 : i32
    return %arg0, %c0_i32 : i32, i32
  }
  func.func @transform_1(%arg0: i32) -> (i32, i32) {
    %c0_i32 = arith.constant 0 : i32
    %c0_i32_0 = arith.constant 0 : i32
    %c0_i32_1 = arith.constant 0 : i32
    return %c0_i32, %c0_i32_0 : i32, i32
  }
  func.func @transform_2(%arg0: i32) -> (i32, i32) {
    %c0_i32 = arith.constant 0 : i32
    %c0_i32_0 = arith.constant 0 : i32
    %c0_i32_1 = arith.constant 0 : i32
    return %c0_i32, %c0_i32_0 : i32, i32
  }
  func.func @transform_3(%arg0: i32) -> (i32, i32) {
    %c0_i32 = arith.constant 0 : i32
    %c0_i32_0 = arith.constant 0 : i32
    %c0_i32_1 = arith.constant 0 : i32
    return %c0_i32, %c0_i32_0 : i32, i32
  }
  func.func @transform_4(%arg0: i32) -> (i32, i32) {
    %c0_i32 = arith.constant 0 : i32
    %c0_i32_0 = arith.constant 0 : i32
    %c0_i32_1 = arith.constant 0 : i32
    return %c0_i32, %c0_i32_0 : i32, i32
  }
  func.func @transform_5(%arg0: i32) -> (i32, i32) {
    %c0_i32 = arith.constant 0 : i32
    %c0_i32_0 = arith.constant 0 : i32
    %c0_i32_1 = arith.constant 0 : i32
    return %c0_i32, %c0_i32_0 : i32, i32
  }
  func.func @transform_6(%arg0: i32) -> (i32, i32) {
    %c0_i32 = arith.constant 0 : i32
    %c0_i32_0 = arith.constant 0 : i32
    %c0_i32_1 = arith.constant 0 : i32
    return %c0_i32, %c0_i32_0 : i32, i32
  }
  func.func @transform_7(%arg0: i32) -> (i32, i32) {
    %c0_i32 = arith.constant 0 : i32
    %c0_i32_0 = arith.constant 0 : i32
    %c0_i32_1 = arith.constant 0 : i32
    return %c0_i32, %c0_i32_0 : i32, i32
  }
  func.func @transform_8(%arg0: i32) -> (i32, i32) {
    %c0_i32 = arith.constant 0 : i32
    %c0_i32_0 = arith.constant 0 : i32
    %c0_i32_1 = arith.constant 0 : i32
    return %c0_i32, %c0_i32_0 : i32, i32
  }
  func.func @transform_9(%arg0: i32) -> (i32, i32) {
    %c0_i32 = arith.constant 0 : i32
    %c0_i32_0 = arith.constant 0 : i32
    return %arg0, %c0_i32 : i32, i32
  }
}

</mosaic_0001>

<bundles_post_ra>
// kernel: tpu_custom_call.1
= control target key start
LH: loop header
LB: loop body
LE: loop exit
PB: predicated region body
PF: predicated region fallthrough
CT: control target
= control target key end

     0   :  { %14 = vsyncpa [#allocation3], 0  ;;  %s1021_s0 = inlined_call_operand.hbm [shape: f32[8,16], index: 0, kind: input, shape index: {}]   ;;  %s1022_s1 = inlined_call_operand.vmem [shape: f32[16,128], index: 1, kind: input, shape index: {}]   ;;  %s1023_s2 = inlined_call_operand.vmem [shape: f32[1,128], index: 2, kind: input, shape index: {}]   ;;  %s1024_s3 = inlined_call_operand.vmem [shape: f32[128,128], index: 3, kind: input, shape index: {}]   ;;  %s1025_s4 = inlined_call_operand.vmem [shape: f32[1,128], index: 4, kind: input, shape index: {}]   ;;  %s1026_s5 = inlined_call_operand.hbm [shape: f32[128,128], index: 5, kind: input, shape index: {}]   ;;  %s1027_s6 = inlined_call_operand.vmem [shape: f32[1,128], index: 6, kind: input, shape index: {}]   ;;  %s1028_s7 = inlined_call_operand.vmem [shape: f32[128,8], index: 7, kind: input, shape index: {}]   ;;  %s1029_s8 = inlined_call_operand.vmem [shape: f32[1,8], index: 8, kind: input, shape index: {}]   ;;  %s1030_s9 = inlined_call_operand.hbm [shape: f32[8,8], index: 9, kind: output, shape index: {}]  }
   0x1   :  { %15 = vsyncpa [#allocation6], 0 }
   0x2   :  { %16 = vsyncpa [#allocation4], 0  ;;  %s773_s30 = smov [#allocation2]   ;;  %s774_s11 = smov [#allocation5]  }
   0x3   :  { %s23_s10 = sshll.u32 %s773_s30, 4  ;;  %s40_s12 = sshll.u32 %s774_s11, 4  ;;  %s24_s10 = int_to_ptr.vmem [resolvable:$true] %s23_s10  ;;  %s831_s12 = int_to_ptr.vmem [resolvable:$true] %s40_s12 }
   0x4   :  { %s701_s15 = scalar_lea.hbm %s1021_s0, 128 }
   0x5   :  { %p702_p0 = scmp.ne.s32.totalorder %s1021_s0, %s701_s15  ;;  %p705_p1 = scmp.lt.u32.totalorder %s701_s15, %s1021_s0 }
   0x7   :  { %p707_p2 = pnand %p705_p1, %p702_p0 }
   0x9   :  { %710 = shalt.err (!%p707_p2)
}
   0xa   :  { %s711_s20 = scalar_lea.vmem %s24_s10, 128  ;;  %p716_p4 = scmp.lt.s32.totalorder %s24_s10, %s24_s10 }
   0xb   :  { %p712_p3 = scmp.ne.s32.totalorder %s24_s10, %s711_s20  ;;  %p717_p5 = scmp.lt.s32.totalorder %s711_s20, %s711_s20 }
   0xd   :  { %p718_p6 = por %p717_p5, %p716_p4 }
   0xf   :  { %p719_p7 = pnand %p718_p6, %p712_p3 }
  0x11   :  { %722 = shalt.err (!%p719_p7)
}
  0x12   :  { %26 = dma.hbm_to_vmem [thread:$0]  %s1021_s0, 128, %s24_s10, [#allocation3]  }
  0x13   :  { %s723_s25 = scalar_lea.hbm %s1026_s5, 2048 }
  0x14   :  { %p724_p8 = scmp.ne.s32.totalorder %s1026_s5, %s723_s25  ;;  %p727_p9 = scmp.lt.u32.totalorder %s723_s25, %s1026_s5 }
  0x16   :  { %p729_p10 = pnand %p727_p9, %p724_p8 }
  0x18   :  { %732 = shalt.err (!%p729_p10)
}
  0x19   :  { %s733_s30 = scalar_lea.vmem %s831_s12, 2048  ;;  %p738_p12 = scmp.lt.s32.totalorder %s831_s12, %s831_s12 }
  0x1a   :  { %p734_p11 = scmp.ne.s32.totalorder %s831_s12, %s733_s30  ;;  %p739_p13 = scmp.lt.s32.totalorder %s733_s30, %s733_s30 }
  0x1c   :  { %p740_p0 = por %p739_p13, %p738_p12 }
  0x1e   :  { %p741_p1 = pnand %p740_p0, %p734_p11 }
  0x20   :  { %744 = shalt.err (!%p741_p1)
}
  0x21   :  { %s775_s0 = smov 128   ;;  %s776_s10 = smov 8  }
  0x22   :  { %46 = dma.hbm_to_vmem [thread:$0]  %s1026_s5, 2048, %s831_s12, [#allocation6], %s775_s0, %s775_s0, %s776_s10  }
  0x23   :  { %767 = dma.done.wait [#allocation3], 128  }
  0x24   :  { %768 = vsyncadd [#allocation3], 4294967168 }
  0x25   :  { %769 = dma.done.wait [#allocation6], 2048  }
  0x26   :  { %770 = vsyncadd [#allocation6], 4294965248  ;;  %v777_v0 = vmov 0.0|0.0   ;;  %vm778_vm0 = vmmov 0   ;;  %v779_v1 = vmov 0.0   ;;  %v60_v2 = vld [vmem:[%s1022_s1] sm:$0xff] }
  0x27   :  { %616 = vmatprep.subr.bf16.mxu0 %v777_v0  ;;  %508 = vmatprep.mubr.msk.f32.mxu0 %vm778_vm0, %v779_v1  ;;  %v61_v3 = vld [vmem:[%s1022_s1 + $0x8] sm:$0xff]  ;;  %v144_v5 = vld [vmem:[%s1024_s3] sm:$0xff]  ;;  %v146_v7 = vld [vmem:[%s1024_s3 + $0x10] sm:$0xff]  ;;  %vm69_vm1 = vcmask 130048   ;;  %vm427_vm2 = vcmask 64512  }
  0x28   :  { %619 = vmatprep.subr.bf16.mxu1 %v777_v0  ;;  %543 = vmatprep.mubr.msk.f32.mxu1 %vm778_vm0, %v779_v1  ;;  %v617_v4 = vpack.c.bf16 %v61_v3, %v60_v2  ;;  %v145_v6 = vld [vmem:[%s1024_s3 + $0x8] sm:$0xff]  ;;  %v147_v9 = vld [vmem:[%s1024_s3 + $0x18] sm:$0xff]  ;;  %v59_v10 = vld [vmem:[#allocation2] sm:$0xff] }
  0x29   :  { %v620_v8 = vpack.c.bf16 %v145_v6, %v144_v5  ;;  %v623_v11 = vpack.c.bf16 %v147_v9, %v146_v7  ;;  %v148_v12 = vld [vmem:[%s1024_s3 + $0x20] sm:$0xff]  ;;  %v149_v13 = vld [vmem:[%s1024_s3 + $0x28] sm:$0xff]  ;;  %v150_v15 = vld [vmem:[%s1024_s3 + $0x30] sm:$0xff] }
  0x2a   :  { %618 = vmatpush3.bf16.msra.mxu0 %v617_v4  ;;  %v626_v14 = vpack.c.bf16 %v149_v13, %v148_v12  ;;  %v151_v16 = vld [vmem:[%s1024_s3 + $0x38] sm:$0xff]  ;;  %v152_v18 = vld [vmem:[%s1024_s3 + $0x40] sm:$0xff]  ;;  %v153_v19 = vld [vmem:[%s1024_s3 + $0x48] sm:$0xff] }
  0x2b   :  { %621 = vmatpush3.bf16.msra.mxu1 %v620_v8  ;;  %643 = vmatprep.subr.bf16.mxu0 %v777_v0  ;;  %v629_v17 = vpack.c.bf16 %v151_v16, %v150_v15  ;;  %v632_v20 = vpack.c.bf16 %v153_v19, %v152_v18  ;;  %v154_v21 = vld [vmem:[%s1024_s3 + $0x50] sm:$0xff]  ;;  %v155_v22 = vld [vmem:[%s1024_s3 + $0x58] sm:$0xff]  ;;  %v156_v24 = vld [vmem:[%s1024_s3 + $0x60] sm:$0xff] }
  0x2c   :  { %622 = vmatprep.subr.bf16.mxu1 %v777_v0  ;;  %v635_v23 = vpack.c.bf16 %v155_v22, %v154_v21  ;;  %v157_v25 = vld [vmem:[%s1024_s3 + $0x68] sm:$0xff]  ;;  %v158_v27 = vld [vmem:[%s1024_s3 + $0x70] sm:$0xff]  ;;  %v159_v28 = vld [vmem:[%s1024_s3 + $0x78] sm:$0xff] }
  0x2d   :  { %509 = vmatmul.mubr.msk.f32.vlgmr.msra.gmra.mrb[0].mxu0 %vm69_vm1, %v59_v10  ;;  %v638_v26 = vpack.c.bf16 %v157_v25, %v156_v24  ;;  %v641_v29 = vpack.c.bf16 %v159_v28, %v158_v27  ;;  %v238_v30 = vld [vmem:[#allocation5] sm:$0xff]  ;;  %v239_v31 = vld [vmem:[#allocation5 + $0x8] sm:$0xff]  ;;  %v240_v32 = vld [vmem:[#allocation5 + $0x10] sm:$0xff] }
  0x2e   :  { %578 = vmatprep.mubr.msk.f32.mxu0 %vm778_vm0, %v779_v1  ;;  %v644_v33 = vpack.c.bf16 %v239_v31, %v238_v30  ;;  %v241_v34 = vld [vmem:[#allocation5 + $0x18] sm:$0xff]  ;;  %v242_v36 = vld [vmem:[#allocation5 + $0x20] sm:$0xff]  ;;  %v243_v37 = vld [vmem:[#allocation5 + $0x28] sm:$0xff] }
  0x2f   :  { %624 = vmatpush3.bf16.msra.mxu1 %v623_v11  ;;  %v647_v35 = vpack.c.bf16 %v241_v34, %v240_v32  ;;  %v650_v38 = vpack.c.bf16 %v243_v37, %v242_v36  ;;  %v244_v39 = vld [vmem:[#allocation5 + $0x30] sm:$0xff]  ;;  %v245_v40 = vld [vmem:[#allocation5 + $0x38] sm:$0xff]  ;;  %v246_v42 = vld [vmem:[#allocation5 + $0x40] sm:$0xff] }
  0x30   :  { %625 = vmatprep.subr.bf16.mxu1 %v777_v0  ;;  %645 = vmatpush3.bf16.msra.mxu0 %v644_v33  ;;  %v653_v41 = vpack.c.bf16 %v245_v40, %v244_v39  ;;  %v247_v43 = vld [vmem:[#allocation5 + $0x48] sm:$0xff]  ;;  %v248_v45 = vld [vmem:[#allocation5 + $0x50] sm:$0xff]  ;;  %v249_v46 = vld [vmem:[#allocation5 + $0x58] sm:$0xff] }
  0x31   :  { %646 = vmatprep.subr.bf16.mxu0 %v777_v0  ;;  %v656_v44 = vpack.c.bf16 %v247_v43, %v246_v42  ;;  %v659_v47 = vpack.c.bf16 %v249_v46, %v248_v45  ;;  %v250_v48 = vld [vmem:[#allocation5 + $0x60] sm:$0xff]  ;;  %v251_v49 = vld [vmem:[#allocation5 + $0x68] sm:$0xff]  ;;  %v445_v51 = vld [vmem:[%s1023_s2] ss:$0 sm:$0xff] }
  0x32   :  { %v662_v50 = vpack.c.bf16 %v251_v49, %v250_v48  ;;  %v252_v56 = vld [vmem:[#allocation5 + $0x70] sm:$0xff]  ;;  %v253_v57 = vld [vmem:[#allocation5 + $0x78] sm:$0xff]  ;;  %v334_v60 = vld [vmem:[%s1028_s7 + $0x8] sm:$0xff] }
  0x33   :  { %627 = vmatpush3.bf16.msra.mxu1 %v626_v14  ;;  %v665_v58 = vpack.c.bf16 %v253_v57, %v252_v56  ;;  %v333_v59 = vld [vmem:[%s1028_s7] sm:$0xff]  ;;  %v335_v61 = vld [vmem:[%s1028_s7 + $0x10] sm:$0xff]  ;;  %v336_v63 = vld [vmem:[%s1028_s7 + $0x18] sm:$0xff] }
  0x34   :  { %628 = vmatprep.subr.bf16.mxu1 %v777_v0  ;;  %648 = vmatpush3.bf16.msra.mxu0 %v647_v35  ;;  %v668_v62 = vpack.c.bf16 %v334_v60, %v333_v59  ;;  %v337_v2 = vld [vmem:[%s1028_s7 + $0x20] sm:$0xff]  ;;  %v338_v3 = vld [vmem:[%s1028_s7 + $0x28] sm:$0xff]  ;;  %v339_v5 = vld [vmem:[%s1028_s7 + $0x30] sm:$0xff] }
  0x35   :  { %649 = vmatprep.subr.bf16.mxu0 %v777_v0  ;;  %v674_v4 = vpack.c.bf16 %v338_v3, %v337_v2  ;;  %v340_v6 = vld [vmem:[%s1028_s7 + $0x38] sm:$0xff]  ;;  %v341_v8 = vld [vmem:[%s1028_s7 + $0x40] sm:$0xff]  ;;  %v342_v9 = vld [vmem:[%s1028_s7 + $0x48] sm:$0xff] }
  0x36   :  { %v677_v7 = vpack.c.bf16 %v340_v6, %v339_v5  ;;  %v680_v10 = vpack.c.bf16 %v342_v9, %v341_v8  ;;  %v343_v11 = vld [vmem:[%s1028_s7 + $0x50] sm:$0xff]  ;;  %v344_v12 = vld [vmem:[%s1028_s7 + $0x58] sm:$0xff]  ;;  %v447_v14 = vld [vmem:[%s1025_s4] ss:$0 sm:$0xff] }
  0x37   :  { %630 = vmatpush3.bf16.msra.mxu1 %v629_v17  ;;  %v683_v13 = vpack.c.bf16 %v344_v12, %v343_v11  ;;  %v345_v19 = vld [vmem:[%s1028_s7 + $0x60] sm:$0xff]  ;;  %v347_v22 = vld [vmem:[%s1028_s7 + $0x70] sm:$0xff] }
  0x38   :  { %631 = vmatprep.subr.bf16.mxu1 %v777_v0  ;;  %651 = vmatpush3.bf16.msra.mxu0 %v650_v38  ;;  %v448_v25 = vld [vmem:[%s1027_s6] ss:$0 sm:$0xff] }
  0x39   :  { %652 = vmatprep.subr.bf16.mxu0 %v777_v0 }
  0x3b   :  { %633 = vmatpush3.bf16.msra.mxu1 %v632_v20  ;;  %v346_v20 = vld [vmem:[%s1028_s7 + $0x68] sm:$0xff] }
  0x3c   :  { %634 = vmatprep.subr.bf16.mxu1 %v777_v0  ;;  %654 = vmatpush3.bf16.msra.mxu0 %v653_v41  ;;  %v686_v21 = vpack.c.bf16 %v346_v20, %v345_v19 }
  0x3d   :  { %655 = vmatprep.subr.bf16.mxu0 %v777_v0 }
  0x3f   :  { %636 = vmatpush3.bf16.msra.mxu1 %v635_v23  ;;  %v348_v23 = vld [vmem:[%s1028_s7 + $0x78] sm:$0xff]  ;;  %s780_s7 = smov [#allocation7]  }
  0x40   :  { %637 = vmatprep.subr.bf16.mxu1 %v777_v0  ;;  %657 = vmatpush3.bf16.msra.mxu0 %v656_v44  ;;  %v689_v24 = vpack.c.bf16 %v348_v23, %v347_v22  ;;  %s435_s13 = sshll.u32 %s780_s7, 4  ;;  %s436_s13 = int_to_ptr.vmem [resolvable:$true] %s435_s13 }
  0x41   :  { %658 = vmatprep.subr.bf16.mxu0 %v777_v0  ;;  %s745_s6 = scalar_lea.vmem %s436_s13, 128  ;;  %p750_p3 = scmp.lt.s32.totalorder %s436_s13, %s436_s13 }
  0x42   :  { %p746_p2 = scmp.ne.s32.totalorder %s436_s13, %s745_s6  ;;  %p751_p4 = scmp.lt.s32.totalorder %s745_s6, %s745_s6 }
  0x43   :  { %639 = vmatpush3.bf16.msra.mxu1 %v638_v26 }
  0x44   :  { %640 = vmatprep.subr.bf16.mxu1 %v777_v0  ;;  %660 = vmatpush3.bf16.msra.mxu0 %v659_v47  ;;  %p752_p5 = por %p751_p4, %p750_p3 }
  0x45   :  { %661 = vmatprep.subr.bf16.mxu0 %v777_v0 }
  0x46   :  { %p753_p6 = pnand %p752_p5, %p746_p2 }
  0x47   :  { %642 = vmatpush3.bf16.msra.mxu1 %v641_v29 }
  0x48   :  { %667 = vmatprep.subr.bf16.mxu1 %v777_v0  ;;  %663 = vmatpush3.bf16.msra.mxu0 %v662_v50 }
  0x49   :  { %664 = vmatprep.subr.bf16.mxu0 %v777_v0 }
  0x4c   :  { %666 = vmatpush3.bf16.msra.mxu0 %v665_v58 }
 0x100   :  { %v139_v52 = vpop.f32.mrb[0].mxu0 }
 0x101   :  { %v140_v53 = vadd.f32 %v445_v51, %v139_v52  ;;  %v510_v54 = vpop.f32.mrb[1].mxu0 }
 0x103   :  { %v143_v55 = vmax.f32 %v140_v53, 0.0 }
 0x105   :  { %544 = vmatmul.mubr.f32.vlgmr.msra.gmra.mrb[0].mxu1 %v143_v55 }
 0x106   :  { %613 = vmatprep.mubr.msk.f32.mxu1 %vm778_vm0, %v779_v1  ;;  %669 = vmatpush3.bf16.msra.mxu1 %v668_v62  ;;  %v671_v1 = vpack.c.bf16 %v336_v63, %v335_v61 }
 0x107   :  { %670 = vmatprep.subr.bf16.mxu1 %v777_v0 }
 0x10a   :  { %672 = vmatpush3.bf16.msra.mxu1 %v671_v1 }
 0x10b   :  { %673 = vmatprep.subr.bf16.mxu1 %v777_v0 }
 0x10e   :  { %675 = vmatpush3.bf16.msra.mxu1 %v674_v4 }
 0x10f   :  { %676 = vmatprep.subr.bf16.mxu1 %v777_v0 }
 0x112   :  { %678 = vmatpush3.bf16.msra.mxu1 %v677_v7 }
 0x113   :  { %679 = vmatprep.subr.bf16.mxu1 %v777_v0 }
 0x116   :  { %681 = vmatpush3.bf16.msra.mxu1 %v680_v10 }
 0x117   :  { %682 = vmatprep.subr.bf16.mxu1 %v777_v0 }
 0x11a   :  { %684 = vmatpush3.bf16.msra.mxu1 %v683_v13 }
 0x11b   :  { %685 = vmatprep.subr.bf16.mxu1 %v777_v0 }
 0x11e   :  { %687 = vmatpush3.bf16.msra.mxu1 %v686_v21 }
 0x11f   :  { %688 = vmatprep.subr.bf16.mxu1 %v777_v0  ;;  %v449_v0 = vld [vmem:[%s1029_s8] ss:$0 sm:$0xff] }
 0x122   :  { %690 = vmatpush3.bf16.msra.mxu1 %v689_v24 }
 0x1d8   :  { %v233_v15 = vpop.f32.mrb[0].mxu1 }
 0x1d9   :  { %v234_v16 = vadd.f32 %v447_v14, %v233_v15  ;;  %v545_v17 = vpop.f32.mrb[1].mxu1 }
 0x1db   :  { %v237_v18 = vmax.f32 %v234_v16, 0.0 }
 0x1dd   :  { %579 = vmatmul.mubr.f32.vlgmr.msra.gmra.mrb[2].mxu0 %v237_v18 }
 0x2b0   :  { %v327_v26 = vpop.f32.mrb[2].mxu0 }
 0x2b1   :  { %v328_v27 = vadd.f32 %v448_v25, %v327_v26  ;;  %v580_v28 = vpop.f32.mrb[3].mxu0 }
 0x2b3   :  { %v331_v29 = vadd.f32 %v328_v27, %v143_v55 }
 0x2b5   :  { %v332_v30 = vmax.f32 %v331_v29, 0.0 }
 0x2b7   :  { %614 = vmatmul.mubr.f32.vlgmr.msra.gmra.mrb[2].mxu1 %v332_v30 }
 0x38a   :  { %v422_v31 = vpop.f32.mrb[2].mxu1 }
 0x38b   :  { %v423_v32 = vadd.f32 %v449_v0, %v422_v31  ;;  %v615_v33 = vpop.f32.mrb[3].mxu1 }
 0x38d   :  { %699 = vtanh.f32 %v423_v32 }
 0x397   :  { %v700_v34 = vpop.eup %699 }
 0x398   :  { %428 = vst.msk [vmem:[#allocation7] sm:$0xff] %vm427_vm2, %v700_v34 }
 0x399   :  { %756 = shalt.err (!%p753_p6)
}
 0x39a   :  { %s757_s8 = scalar_lea.hbm %s1030_s9, 128 }
 0x39b   :  { %p758_p7 = scmp.ne.s32.totalorder %s1030_s9, %s757_s8  ;;  %p761_p8 = scmp.lt.u32.totalorder %s757_s8, %s1030_s9 }
 0x39d   :  { %p763_p9 = pnand %p761_p8, %p758_p7 }
 0x39f   :  { %766 = shalt.err (!%p763_p9)
}
 0x3a0   :  { %438 = dma.vmem_to_hbm [thread:$0]  %s436_s13, 128, %s1030_s9, [#allocation4]  }
 0x3a1   :  { %771 = dma.done.wait [#allocation4], 128  }
 0x3a2   :  { %772 = vsyncadd [#allocation4], 4294967168 }
 0x3a3   :  { %442 = vsyncpa [#allocation3], 1 }
 0x3a4   :  { %443 = vsyncpa [#allocation6], 1 }
 0x3a5   :  { %444 = vsyncpa [#allocation4], 1 }

// kernel: tpu_custom_call.1
= control target key start
LH: loop header
LB: loop body
LE: loop exit
PB: predicated region body
PF: predicated region fallthrough
CT: control target
= control target key end

     0   :  { %14 = vsyncpa [#allocation3], 0  ;;  %s1021_s0 = inlined_call_operand.hbm [shape: f32[8,16], index: 0, kind: input, shape index: {}]   ;;  %s1022_s1 = inlined_call_operand.vmem [shape: f32[16,128], index: 1, kind: input, shape index: {}]   ;;  %s1023_s2 = inlined_call_operand.vmem [shape: f32[1,128], index: 2, kind: input, shape index: {}]   ;;  %s1024_s3 = inlined_call_operand.vmem [shape: f32[128,128], index: 3, kind: input, shape index: {}]   ;;  %s1025_s4 = inlined_call_operand.vmem [shape: f32[1,128], index: 4, kind: input, shape index: {}]   ;;  %s1026_s5 = inlined_call_operand.hbm [shape: f32[128,128], index: 5, kind: input, shape index: {}]   ;;  %s1027_s6 = inlined_call_operand.vmem [shape: f32[1,128], index: 6, kind: input, shape index: {}]   ;;  %s1028_s7 = inlined_call_operand.vmem [shape: f32[128,8], index: 7, kind: input, shape index: {}]   ;;  %s1029_s8 = inlined_call_operand.vmem [shape: f32[1,8], index: 8, kind: input, shape index: {}]   ;;  %s1030_s9 = inlined_call_operand.hbm [shape: f32[8,8], index: 9, kind: output, shape index: {}]  }
   0x1   :  { %15 = vsyncpa [#allocation6], 0 }
   0x2   :  { %16 = vsyncpa [#allocation4], 0  ;;  %s773_s30 = smov [#allocation2]   ;;  %s774_s11 = smov [#allocation5]  }
   0x3   :  { %s23_s10 = sshll.u32 %s773_s30, 4  ;;  %s40_s12 = sshll.u32 %s774_s11, 4  ;;  %s24_s10 = int_to_ptr.vmem [resolvable:$true] %s23_s10  ;;  %s831_s12 = int_to_ptr.vmem [resolvable:$true] %s40_s12 }
   0x4   :  { %s701_s15 = scalar_lea.hbm %s1021_s0, 128 }
   0x5   :  { %p702_p0 = scmp.ne.s32.totalorder %s1021_s0, %s701_s15  ;;  %p705_p1 = scmp.lt.u32.totalorder %s701_s15, %s1021_s0 }
   0x7   :  { %p707_p2 = pnand %p705_p1, %p702_p0 }
   0x9   :  { %710 = shalt.err (!%p707_p2)
}
   0xa   :  { %s711_s20 = scalar_lea.vmem %s24_s10, 128  ;;  %p716_p4 = scmp.lt.s32.totalorder %s24_s10, %s24_s10 }
   0xb   :  { %p712_p3 = scmp.ne.s32.totalorder %s24_s10, %s711_s20  ;;  %p717_p5 = scmp.lt.s32.totalorder %s711_s20, %s711_s20 }
   0xd   :  { %p718_p6 = por %p717_p5, %p716_p4 }
   0xf   :  { %p719_p7 = pnand %p718_p6, %p712_p3 }
  0x11   :  { %722 = shalt.err (!%p719_p7)
}
  0x12   :  { %26 = dma.hbm_to_vmem [thread:$0]  %s1021_s0, 128, %s24_s10, [#allocation3]  }
  0x13   :  { %s723_s25 = scalar_lea.hbm %s1026_s5, 2048 }
  0x14   :  { %p724_p8 = scmp.ne.s32.totalorder %s1026_s5, %s723_s25  ;;  %p727_p9 = scmp.lt.u32.totalorder %s723_s25, %s1026_s5 }
  0x16   :  { %p729_p10 = pnand %p727_p9, %p724_p8 }
  0x18   :  { %732 = shalt.err (!%p729_p10)
}
  0x19   :  { %s733_s30 = scalar_lea.vmem %s831_s12, 2048  ;;  %p738_p12 = scmp.lt.s32.totalorder %s831_s12, %s831_s12 }
  0x1a   :  { %p734_p11 = scmp.ne.s32.totalorder %s831_s12, %s733_s30  ;;  %p739_p13 = scmp.lt.s32.totalorder %s733_s30, %s733_s30 }
  0x1c   :  { %p740_p0 = por %p739_p13, %p738_p12 }
  0x1e   :  { %p741_p1 = pnand %p740_p0, %p734_p11 }
  0x20   :  { %744 = shalt.err (!%p741_p1)
}
  0x21   :  { %s775_s0 = smov 128   ;;  %s776_s10 = smov 8  }
  0x22   :  { %46 = dma.hbm_to_vmem [thread:$0]  %s1026_s5, 2048, %s831_s12, [#allocation6], %s775_s0, %s775_s0, %s776_s10  }
  0x23   :  { %767 = dma.done.wait [#allocation3], 128  }
  0x24   :  { %768 = vsyncadd [#allocation3], 4294967168 }
  0x25   :  { %769 = dma.done.wait [#allocation6], 2048  }
  0x26   :  { %770 = vsyncadd [#allocation6], 4294965248  ;;  %v777_v0 = vmov 0.0|0.0   ;;  %vm778_vm0 = vmmov 0   ;;  %v779_v1 = vmov 0.0   ;;  %v60_v2 = vld [vmem:[%s1022_s1] sm:$0xff] }
  0x27   :  { %616 = vmatprep.subr.bf16.mxu0 %v777_v0  ;;  %508 = vmatprep.mubr.msk.f32.mxu0 %vm778_vm0, %v779_v1  ;;  %v61_v3 = vld [vmem:[%s1022_s1 + $0x8] sm:$0xff]  ;;  %v144_v5 = vld [vmem:[%s1024_s3] sm:$0xff]  ;;  %v146_v7 = vld [vmem:[%s1024_s3 + $0x10] sm:$0xff]  ;;  %vm69_vm1 = vcmask 130048   ;;  %vm427_vm2 = vcmask 64512  }
  0x28   :  { %619 = vmatprep.subr.bf16.mxu1 %v777_v0  ;;  %543 = vmatprep.mubr.msk.f32.mxu1 %vm778_vm0, %v779_v1  ;;  %v617_v4 = vpack.c.bf16 %v61_v3, %v60_v2  ;;  %v145_v6 = vld [vmem:[%s1024_s3 + $0x8] sm:$0xff]  ;;  %v147_v9 = vld [vmem:[%s1024_s3 + $0x18] sm:$0xff]  ;;  %v59_v10 = vld [vmem:[#allocation2] sm:$0xff] }
  0x29   :  { %v620_v8 = vpack.c.bf16 %v145_v6, %v144_v5  ;;  %v623_v11 = vpack.c.bf16 %v147_v9, %v146_v7  ;;  %v148_v12 = vld [vmem:[%s1024_s3 + $0x20] sm:$0xff]  ;;  %v149_v13 = vld [vmem:[%s1024_s3 + $0x28] sm:$0xff]  ;;  %v150_v15 = vld [vmem:[%s1024_s3 + $0x30] sm:$0xff] }
  0x2a   :  { %618 = vmatpush3.bf16.msra.mxu0 %v617_v4  ;;  %v626_v14 = vpack.c.bf16 %v149_v13, %v148_v12  ;;  %v151_v16 = vld [vmem:[%s1024_s3 + $0x38] sm:$0xff]  ;;  %v152_v18 = vld [vmem:[%s1024_s3 + $0x40] sm:$0xff]  ;;  %v153_v19 = vld [vmem:[%s1024_s3 + $0x48] sm:$0xff] }
  0x2b   :  { %621 = vmatpush3.bf16.msra.mxu1 %v620_v8  ;;  %643 = vmatprep.subr.bf16.mxu0 %v777_v0  ;;  %v629_v17 = vpack.c.bf16 %v151_v16, %v150_v15  ;;  %v632_v20 = vpack.c.bf16 %v153_v19, %v152_v18  ;;  %v154_v21 = vld [vmem:[%s1024_s3 + $0x50] sm:$0xff]  ;;  %v155_v22 = vld [vmem:[%s1024_s3 + $0x58] sm:$0xff]  ;;  %v156_v24 = vld [vmem:[%s1024_s3 + $0x60] sm:$0xff] }
  0x2c   :  { %622 = vmatprep.subr.bf16.mxu1 %v777_v0  ;;  %v635_v23 = vpack.c.bf16 %v155_v22, %v154_v21  ;;  %v157_v25 = vld [vmem:[%s1024_s3 + $0x68] sm:$0xff]  ;;  %v158_v27 = vld [vmem:[%s1024_s3 + $0x70] sm:$0xff]  ;;  %v159_v28 = vld [vmem:[%s1024_s3 + $0x78] sm:$0xff] }
  0x2d   :  { %509 = vmatmul.mubr.msk.f32.vlgmr.msra.gmra.mrb[0].mxu0 %vm69_vm1, %v59_v10  ;;  %v638_v26 = vpack.c.bf16 %v157_v25, %v156_v24  ;;  %v641_v29 = vpack.c.bf16 %v159_v28, %v158_v27  ;;  %v238_v30 = vld [vmem:[#allocation5] sm:$0xff]  ;;  %v239_v31 = vld [vmem:[#allocation5 + $0x8] sm:$0xff]  ;;  %v240_v32 = vld [vmem:[#allocation5 + $0x10] sm:$0xff] }
  0x2e   :  { %578 = vmatprep.mubr.msk.f32.mxu0 %vm778_vm0, %v779_v1  ;;  %v644_v33 = vpack.c.bf16 %v239_v31, %v238_v30  ;;  %v241_v34 = vld [vmem:[#allocation5 + $0x18] sm:$0xff]  ;;  %v242_v36 = vld [vmem:[#allocation5 + $0x20] sm:$0xff]  ;;  %v243_v37 = vld [vmem:[#allocation5 + $0x28] sm:$0xff] }
  0x2f   :  { %624 = vmatpush3.bf16.msra.mxu1 %v623_v11  ;;  %v647_v35 = vpack.c.bf16 %v241_v34, %v240_v32  ;;  %v650_v38 = vpack.c.bf16 %v243_v37, %v242_v36  ;;  %v244_v39 = vld [vmem:[#allocation5 + $0x30] sm:$0xff]  ;;  %v245_v40 = vld [vmem:[#allocation5 + $0x38] sm:$0xff]  ;;  %v246_v42 = vld [vmem:[#allocation5 + $0x40] sm:$0xff] }
  0x30   :  { %625 = vmatprep.subr.bf16.mxu1 %v777_v0  ;;  %645 = vmatpush3.bf16.msra.mxu0 %v644_v33  ;;  %v653_v41 = vpack.c.bf16 %v245_v40, %v244_v39  ;;  %v247_v43 = vld [vmem:[#allocation5 + $0x48] sm:$0xff]  ;;  %v248_v45 = vld [vmem:[#allocation5 + $0x50] sm:$0xff]  ;;  %v249_v46 = vld [vmem:[#allocation5 + $0x58] sm:$0xff] }
  0x31   :  { %646 = vmatprep.subr.bf16.mxu0 %v777_v0  ;;  %v656_v44 = vpack.c.bf16 %v247_v43, %v246_v42  ;;  %v659_v47 = vpack.c.bf16 %v249_v46, %v248_v45  ;;  %v250_v48 = vld [vmem:[#allocation5 + $0x60] sm:$0xff]  ;;  %v251_v49 = vld [vmem:[#allocation5 + $0x68] sm:$0xff]  ;;  %v445_v51 = vld [vmem:[%s1023_s2] ss:$0 sm:$0xff] }
  0x32   :  { %v662_v50 = vpack.c.bf16 %v251_v49, %v250_v48  ;;  %v252_v56 = vld [vmem:[#allocation5 + $0x70] sm:$0xff]  ;;  %v253_v57 = vld [vmem:[#allocation5 + $0x78] sm:$0xff]  ;;  %v334_v60 = vld [vmem:[%s1028_s7 + $0x8] sm:$0xff] }
  0x33   :  { %627 = vmatpush3.bf16.msra.mxu1 %v626_v14  ;;  %v665_v58 = vpack.c.bf16 %v253_v57, %v252_v56  ;;  %v333_v59 = vld [vmem:[%s1028_s7] sm:$0xff]  ;;  %v335_v61 = vld [vmem:[%s1028_s7 + $0x10] sm:$0xff]  ;;  %v336_v63 = vld [vmem:[%s1028_s7 + $0x18] sm:$0xff] }
  0x34   :  { %628 = vmatprep.subr.bf16.mxu1 %v777_v0  ;;  %648 = vmatpush3.bf16.msra.mxu0 %v647_v35  ;;  %v668_v62 = vpack.c.bf16 %v334_v60, %v333_v59  ;;  %v337_v2 = vld [vmem:[%s1028_s7 + $0x20] sm:$0xff]  ;;  %v338_v3 = vld [vmem:[%s1028_s7 + $0x28] sm:$0xff]  ;;  %v339_v5 = vld [vmem:[%s1028_s7 + $0x30] sm:$0xff] }
  0x35   :  { %649 = vmatprep.subr.bf16.mxu0 %v777_v0  ;;  %v674_v4 = vpack.c.bf16 %v338_v3, %v337_v2  ;;  %v340_v6 = vld [vmem:[%s1028_s7 + $0x38] sm:$0xff]  ;;  %v341_v8 = vld [vmem:[%s1028_s7 + $0x40] sm:$0xff]  ;;  %v342_v9 = vld [vmem:[%s1028_s7 + $0x48] sm:$0xff] }
  0x36   :  { %v677_v7 = vpack.c.bf16 %v340_v6, %v339_v5  ;;  %v680_v10 = vpack.c.bf16 %v342_v9, %v341_v8  ;;  %v343_v11 = vld [vmem:[%s1028_s7 + $0x50] sm:$0xff]  ;;  %v344_v12 = vld [vmem:[%s1028_s7 + $0x58] sm:$0xff]  ;;  %v447_v14 = vld [vmem:[%s1025_s4] ss:$0 sm:$0xff] }
  0x37   :  { %630 = vmatpush3.bf16.msra.mxu1 %v629_v17  ;;  %v683_v13 = vpack.c.bf16 %v344_v12, %v343_v11  ;;  %v345_v19 = vld [vmem:[%s1028_s7 + $0x60] sm:$0xff]  ;;  %v347_v22 = vld [vmem:[%s1028_s7 + $0x70] sm:$0xff] }
  0x38   :  { %631 = vmatprep.subr.bf16.mxu1 %v777_v0  ;;  %651 = vmatpush3.bf16.msra.mxu0 %v650_v38  ;;  %v448_v25 = vld [vmem:[%s1027_s6] ss:$0 sm:$0xff] }
  0x39   :  { %652 = vmatprep.subr.bf16.mxu0 %v777_v0 }
  0x3b   :  { %633 = vmatpush3.bf16.msra.mxu1 %v632_v20  ;;  %v346_v20 = vld [vmem:[%s1028_s7 + $0x68] sm:$0xff] }
  0x3c   :  { %634 = vmatprep.subr.bf16.mxu1 %v777_v0  ;;  %654 = vmatpush3.bf16.msra.mxu0 %v653_v41  ;;  %v686_v21 = vpack.c.bf16 %v346_v20, %v345_v19 }
  0x3d   :  { %655 = vmatprep.subr.bf16.mxu0 %v777_v0 }
  0x3f   :  { %636 = vmatpush3.bf16.msra.mxu1 %v635_v23  ;;  %v348_v23 = vld [vmem:[%s1028_s7 + $0x78] sm:$0xff]  ;;  %s780_s7 = smov [#allocation7]  }
  0x40   :  { %637 = vmatprep.subr.bf16.mxu1 %v777_v0  ;;  %657 = vmatpush3.bf16.msra.mxu0 %v656_v44  ;;  %v689_v24 = vpack.c.bf16 %v348_v23, %v347_v22  ;;  %s435_s13 = sshll.u32 %s780_s7, 4  ;;  %s436_s13 = int_to_ptr.vmem [resolvable:$true] %s435_s13 }
  0x41   :  { %658 = vmatprep.subr.bf16.mxu0 %v777_v0  ;;  %s745_s6 = scalar_lea.vmem %s436_s13, 128  ;;  %p750_p3 = scmp.lt.s32.totalorder %s436_s13, %s436_s13 }
  0x42   :  { %p746_p2 = scmp.ne.s32.totalorder %s436_s13, %s745_s6  ;;  %p751_p4 = scmp.lt.s32.totalorder %s745_s6, %s745_s6 }
  0x43   :  { %639 = vmatpush3.bf16.msra.mxu1 %v638_v26 }
  0x44   :  { %640 = vmatprep.subr.bf16.mxu1 %v777_v0  ;;  %660 = vmatpush3.bf16.msra.mxu0 %v659_v47  ;;  %p752_p5 = por %p751_p4, %p750_p3 }
  0x45   :  { %661 = vmatprep.subr.bf16.mxu0 %v777_v0 }
  0x46   :  { %p753_p6 = pnand %p752_p5, %p746_p2 }
  0x47   :  { %642 = vmatpush3.bf16.msra.mxu1 %v641_v29 }
  0x48   :  { %667 = vmatprep.subr.bf16.mxu1 %v777_v0  ;;  %663 = vmatpush3.bf16.msra.mxu0 %v662_v50 }
  0x49   :  { %664 = vmatprep.subr.bf16.mxu0 %v777_v0 }
  0x4c   :  { %666 = vmatpush3.bf16.msra.mxu0 %v665_v58 }
 0x100   :  { %v139_v52 = vpop.f32.mrb[0].mxu0 }
 0x101   :  { %v140_v53 = vadd.f32 %v445_v51, %v139_v52  ;;  %v510_v54 = vpop.f32.mrb[1].mxu0 }
 0x103   :  { %v143_v55 = vmax.f32 %v140_v53, 0.0 }
 0x105   :  { %544 = vmatmul.mubr.f32.vlgmr.msra.gmra.mrb[0].mxu1 %v143_v55 }
 0x106   :  { %613 = vmatprep.mubr.msk.f32.mxu1 %vm778_vm0, %v779_v1  ;;  %669 = vmatpush3.bf16.msra.mxu1 %v668_v62  ;;  %v671_v1 = vpack.c.bf16 %v336_v63, %v335_v61 }
 0x107   :  { %670 = vmatprep.subr.bf16.mxu1 %v777_v0 }
 0x10a   :  { %672 = vmatpush3.bf16.msra.mxu1 %v671_v1 }
 0x10b   :  { %673 = vmatprep.subr.bf16.mxu1 %v777_v0 }
 0x10e   :  { %675 = vmatpush3.bf16.msra.mxu1 %v674_v4 }
 0x10f   :  { %676 = vmatprep.subr.bf16.mxu1 %v777_v0 }
 0x112   :  { %678 = vmatpush3.bf16.msra.mxu1 %v677_v7 }
 0x113   :  { %679 = vmatprep.subr.bf16.mxu1 %v777_v0 }
 0x116   :  { %681 = vmatpush3.bf16.msra.mxu1 %v680_v10 }
 0x117   :  { %682 = vmatprep.subr.bf16.mxu1 %v777_v0 }
 0x11a   :  { %684 = vmatpush3.bf16.msra.mxu1 %v683_v13 }
 0x11b   :  { %685 = vmatprep.subr.bf16.mxu1 %v777_v0 }
 0x11e   :  { %687 = vmatpush3.bf16.msra.mxu1 %v686_v21 }
 0x11f   :  { %688 = vmatprep.subr.bf16.mxu1 %v777_v0  ;;  %v449_v0 = vld [vmem:[%s1029_s8] ss:$0 sm:$0xff] }
 0x122   :  { %690 = vmatpush3.bf16.msra.mxu1 %v689_v24 }
 0x1d8   :  { %v233_v15 = vpop.f32.mrb[0].mxu1 }
 0x1d9   :  { %v234_v16 = vadd.f32 %v447_v14, %v233_v15  ;;  %v545_v17 = vpop.f32.mrb[1].mxu1 }
 0x1db   :  { %v237_v18 = vmax.f32 %v234_v16, 0.0 }
 0x1dd   :  { %579 = vmatmul.mubr.f32.vlgmr.msra.gmra.mrb[2].mxu0 %v237_v18 }
 0x2b0   :  { %v327_v26 = vpop.f32.mrb[2].mxu0 }
 0x2b1   :  { %v328_v27 = vadd.f32 %v448_v25, %v327_v26  ;;  %v580_v28 = vpop.f32.mrb[3].mxu0 }
 0x2b3   :  { %v331_v29 = vadd.f32 %v328_v27, %v143_v55 }
 0x2b5   :  { %v332_v30 = vmax.f32 %v331_v29, 0.0 }
 0x2b7   :  { %614 = vmatmul.mubr.f32.vlgmr.msra.gmra.mrb[2].mxu1 %v332_v30 }
 0x38a   :  { %v422_v31 = vpop.f32.mrb[2].mxu1 }
 0x38b   :  { %v423_v32 = vadd.f32 %v449_v0, %v422_v31  ;;  %v615_v33 = vpop.f32.mrb[3].mxu1 }
 0x38d   :  { %699 = vtanh.f32 %v423_v32 }
 0x397   :  { %v700_v34 = vpop.eup %699 }
 0x398   :  { %428 = vst.msk [vmem:[#allocation7] sm:$0xff] %vm427_vm2, %v700_v34 }
 0x399   :  { %756 = shalt.err (!%p753_p6)
}
 0x39a   :  { %s757_s8 = scalar_lea.hbm %s1030_s9, 128 }
 0x39b   :  { %p758_p7 = scmp.ne.s32.totalorder %s1030_s9, %s757_s8  ;;  %p761_p8 = scmp.lt.u32.totalorder %s757_s8, %s1030_s9 }
 0x39d   :  { %p763_p9 = pnand %p761_p8, %p758_p7 }
 0x39f   :  { %766 = shalt.err (!%p763_p9)
}
 0x3a0   :  { %438 = dma.vmem_to_hbm [thread:$0]  %s436_s13, 128, %s1030_s9, [#allocation4]  }
 0x3a1   :  { %771 = dma.done.wait [#allocation4], 128  }
 0x3a2   :  { %772 = vsyncadd [#allocation4], 4294967168 }
 0x3a3   :  { %442 = vsyncpa [#allocation3], 1 }
 0x3a4   :  { %443 = vsyncpa [#allocation6], 1 }
 0x3a5   :  { %444 = vsyncpa [#allocation4], 1 }

</bundles_post_ra>
